<compile_context>
chip_gen: v5e
topology: v5e:2x2
jax: 0.10.0
libtpu: 0.0.40
codegen_flags: <defaults>
</compile_context>

<pallas_src>
import jax
import jax.numpy as jnp
from jax.experimental import pallas as pl
from jax.experimental.pallas import tpu as pltpu

_SLOPE = 0.1        # the module explicitly uses nn.LeakyReLU(0.1)
_LANE = 128


def _leaky_relu(v, slope=_SLOPE):
    return jnp.where(v > 0, v, slope * v)


def _round_up(n, m):
    return ((n + m - 1) // m) * m


# --------------------------------------------------------------------------
# Kernels (one batch tile per grid step; weights are VMEM-resident)
# --------------------------------------------------------------------------

def _block_kernel_downsample(x_ref, wa_ref, ba_ref, w2_ref, b2_ref, o_ref):
    """fc1 and downsample fused into one matmul (wa = [w1 | wd])."""
    fp = o_ref.shape[-1]                              # padded out_features
    x = x_ref[...]
    # One MXU pass for both fc1 and the downsample Linear (shared LHS).
    r = jnp.dot(x.astype(wa_ref.dtype), wa_ref[...],
                preferred_element_type=jnp.float32) + ba_ref[...]
    h = _leaky_relu(r[:, :fp])                        # fc1 + LeakyReLU
    idn = _leaky_relu(r[:, fp:])                      # downsample branch
    # fc2
    out = jnp.dot(h.astype(w2_ref.dtype), w2_ref[...],
                  preferred_element_type=jnp.float32) + b2_ref[...]
    # residual add + final LeakyReLU (all f32, lane-dense store)
    o_ref[...] = _leaky_relu(out + idn).astype(o_ref.dtype)


def _block_kernel_identity(x_ref, w1_ref, b1_ref, w2_ref, b2_ref, o_ref):
    """in_features == out_features: identity skip connection."""
    x = x_ref[...]
    h = _leaky_relu(jnp.dot(x.astype(w1_ref.dtype), w1_ref[...],
                            preferred_element_type=jnp.float32) + b1_ref[...])
    out = jnp.dot(h.astype(w2_ref.dtype), w2_ref[...],
                  preferred_element_type=jnp.float32) + b2_ref[...]
    o_ref[...] = _leaky_relu(out + x.astype(jnp.float32)).astype(o_ref.dtype)


# --------------------------------------------------------------------------
# Host-side weight preparation (done once, not per forward call)
# --------------------------------------------------------------------------

def prepare_block_params(params, compute_dtype=jnp.bfloat16):
    """Fuse fc1 with the downsample Linear, zero-pad out_features to a multiple
    of 128 lanes, and cast weights to the MXU operand dtype (biases stay f32)."""
    fin, fout = params["w1"].shape
    fout_p = _round_up(fout, _LANE)
    pad_c = fout_p - fout
    has_downsample = "wd" in params

    pad_cols = lambda a: jnp.pad(a, ((0, 0), (0, pad_c)))

    prep = {
        "fin": fin,
        "fout": fout,
        "fout_p": fout_p,
        "has_downsample": has_downsample,
        # fc2: pad both rows (h is fout_p wide) and cols (output lanes).
        "w2": jnp.pad(params["w2"], ((0, pad_c), (0, pad_c))).astype(compute_dtype),
        "b2": pad_cols(params["b2"]).astype(jnp.float32),
    }
    if has_downsample:
        w1 = pad_cols(params["w1"])
        wd = pad_cols(params["wd"])
        prep["wa"] = jnp.concatenate([w1, wd], axis=1).astype(compute_dtype)
        prep["ba"] = jnp.concatenate(
            [pad_cols(params["b1"]), pad_cols(params["bd"])], axis=1
        ).astype(jnp.float32)
    else:
        # fin == fout: x is padded to fout_p lanes in the wrapper, so pad rows too.
        prep["w1"] = jnp.pad(params["w1"], ((0, pad_c), (0, pad_c))).astype(compute_dtype)
        prep["b1"] = pad_cols(params["b1"]).astype(jnp.float32)
    return prep


# --------------------------------------------------------------------------
# Wrapper
# --------------------------------------------------------------------------

def dense_residual_block(x, prep, *, batch_tile=512):
    """x: (B, in_features) float32. prep: output of prepare_block_params."""
    B = x.shape[0]
    fout, fout_p = prep["fout"], prep["fout_p"]

    if prep["has_downsample"]:
        kernel = _block_kernel_downsample
        weights = (prep["wa"], prep["ba"], prep["w2"], prep["b2"])
    else:
        kernel = _block_kernel_identity
        # Identity skip: zero-pad x's feature dim so the residual add and the
        # output stay lane-dense (padded lanes stay exactly zero).
        if x.shape[1] != fout_p:
            x = jnp.pad(x, ((0, 0), (0, fout_p - x.shape[1])))
        weights = (prep["w1"], prep["b1"], prep["w2"], prep["b2"])

    fin_x = x.shape[1]
    # Batch tile: multiple of 8 (or the full batch); weights stay resident, so
    # per-step VMEM is just the double-buffered x/out tiles (fits v7x's 64 MiB).
    tb = B if B <= batch_tile else batch_tile
    grid = (pl.cdiv(B, tb),)

    in_specs = [pl.BlockSpec((tb, fin_x), lambda i: (i, 0))]
    in_specs += [pl.BlockSpec(w.shape, lambda i: (0, 0)) for w in weights]
    out_specs = pl.BlockSpec((tb, fout_p), lambda i: (i, 0))

    # Advisory cost hint: 2 (or 3, fused) matmuls per row + activation bytes.
    n_mm_cols = weights[0].shape[1] + prep["w2"].shape[1]
    flops = 2 * B * (fin_x * weights[0].shape[1] + fout_p * fout_p)
    bytes_accessed = (
        x.size * x.dtype.itemsize
        + sum(int(w.size) * w.dtype.itemsize for w in weights)
        + B * fout_p * x.dtype.itemsize
    )
    cost = pl.CostEstimate(flops=flops, transcendentals=0,
                           bytes_accessed=bytes_accessed)
    del n_mm_cols

    out_p = pl.pallas_call(
        kernel,
        out_shape=jax.ShapeDtypeStruct((B, fout_p), x.dtype),
        grid=grid,
        in_specs=in_specs,
        out_specs=out_specs,
        compiler_params=pltpu.CompilerParams(
            dimension_semantics=("parallel",)),   # shards batch tiles over TCs
        cost_estimate=cost,
    )(x, *weights)

    return out_p[:, :fout] if fout_p != fout else out_p


# --------------------------------------------------------------------------
# Init + plain-JAX reference (mirrors the PyTorch forward, unfused, f32)
# --------------------------------------------------------------------------

def init_params(key, in_features, out_features, dtype=jnp.float32):
    """Deterministic PyTorch-style (uniform fan-in) init. Weights stored (in, out)."""
    ks = jax.random.split(key, 6)

    def linear(kw, kb, fan_in, fan_out):
        bound = 1.0 / jnp.sqrt(fan_in)
        w = jax.random.uniform(kw, (fan_in, fan_out), dtype, -bound, bound)
        b = jax.random.uniform(kb, (1, fan_out), dtype, -bound, bound)
        return w, b

    p = {}
    p["w1"], p["b1"] = linear(ks[0], ks[1], in_features, out_features)
    p["w2"], p["b2"] = linear(ks[2], ks[3], out_features, out_features)
    if in_features != out_features:
        p["wd"], p["bd"] = linear(ks[4], ks[5], in_features, out_features)
    return p


def reference(x, params):
    h = _leaky_relu(x @ params["w1"] + params["b1"])
    out = h @ params["w2"] + params["b2"]
    if "wd" in params:
        idn = _leaky_relu(x @ params["wd"] + params["bd"])
    else:
        idn = x
    return _leaky_relu(out + idn)


# --------------------------------------------------------------------------

if __name__ == "__main__":
    key = jax.random.PRNGKey(0)
    kx, kp1, kp2 = jax.random.split(key, 3)

    # Case 1: in_features != out_features -> fused fc1|downsample path.
    B, fin, fout = 16, 32, 64
    x = jax.random.normal(kx, (B, fin), jnp.float32)
    params = init_params(kp1, fin, fout)
    y_ref = reference(x, params)

    prep_f32 = prepare_block_params(params, compute_dtype=jnp.float32)
    y = jax.block_until_ready(dense_residual_block(x, prep_f32))
    assert y.shape == (B, fout)
    assert jnp.allclose(y, y_ref, atol=1e-4, rtol=1e-4)

    prep_bf16 = prepare_block_params(params, compute_dtype=jnp.bfloat16)
    y_bf = jax.block_until_ready(dense_residual_block(x, prep_bf16))
    assert jnp.allclose(y_bf, y_ref, atol=5e-2, rtol=5e-2)

    # Case 2: in_features == out_features -> identity-skip path.
    B2, f = 16, 64
    x2 = jax.random.normal(jax.random.fold_in(kx, 1), (B2, f), jnp.float32)
    params2 = init_params(kp2, f, f)
    y2_ref = reference(x2, params2)

    prep2_f32 = prepare_block_params(params2, compute_dtype=jnp.float32)
    y2 = jax.block_until_ready(dense_residual_block(x2, prep2_f32))
    assert y2.shape == (B2, f)
    assert jnp.allclose(y2, y2_ref, atol=1e-4, rtol=1e-4)

    prep2_bf16 = prepare_block_params(params2, compute_dtype=jnp.bfloat16)
    y2_bf = jax.block_until_ready(dense_residual_block(x2, prep2_bf16))
    assert jnp.allclose(y2_bf, y2_ref, atol=5e-2, rtol=5e-2)

    # Case 3: batch larger than one tile -> exercises the pipelined grid path.
    B3 = 1024
    x3 = jax.random.normal(jax.random.fold_in(kx, 2), (B3, fin), jnp.float32)
    y3 = jax.block_until_ready(dense_residual_block(x3, prep_f32, batch_tile=256))
    y3_ref = reference(x3, params)
    assert y3.shape == (B3, fout)
    assert jnp.allclose(y3, y3_ref, atol=1e-4, rtol=1e-4)

    print("KERNEL_OK")
</pallas_src>

<mosaic_0001>
module attributes {stable_mosaic.version = 11 : i64} {
  func.func @_block_kernel_downsample(%arg0: i32, %arg1: memref<16x32xf32, #tpu.memory_space<vmem>>, %arg2: memref<32x256xf32, #tpu.memory_space<vmem>>, %arg3: memref<1x256xf32, #tpu.memory_space<vmem>>, %arg4: memref<128x128xf32, #tpu.memory_space<vmem>>, %arg5: memref<1x128xf32, #tpu.memory_space<vmem>>, %arg6: memref<16x128xf32, #tpu.memory_space<vmem>>) attributes {dimension_semantics = [#tpu.dimension_semantics<parallel>], iteration_bounds = array<i64: 1>, scalar_prefetch = 0 : i64, scratch_operands = 0 : i64, tpu.core_type = #tpu.core_type<tc>, window_params = [{transform_indices = @transform_0, window_bounds = array<i64: 16, 32>}, {pipeline_mode = #tpu.pipeline_mode<synchronous>, transform_indices = @transform_1, window_bounds = array<i64: 32, 256>}, {pipeline_mode = #tpu.pipeline_mode<synchronous>, transform_indices = @transform_2, window_bounds = array<i64: 1, 256>}, {pipeline_mode = #tpu.pipeline_mode<synchronous>, transform_indices = @transform_3, window_bounds = array<i64: 128, 128>}, {pipeline_mode = #tpu.pipeline_mode<synchronous>, transform_indices = @transform_4, window_bounds = array<i64: 1, 128>}, {transform_indices = @transform_5, window_bounds = array<i64: 16, 128>}]} {
    %c0 = arith.constant 0 : index
    %c0_0 = arith.constant 0 : index
    %0 = vector.load %arg1[%c0, %c0_0] : memref<16x32xf32, #tpu.memory_space<vmem>>, vector<16x32xf32>
    %c0_1 = arith.constant 0 : index
    %c0_2 = arith.constant 0 : index
    %1 = vector.load %arg2[%c0_1, %c0_2] : memref<32x256xf32, #tpu.memory_space<vmem>>, vector<32x256xf32>
    %cst = arith.constant dense<0.000000e+00> : vector<16x256xf32>
    %2 = tpu.matmul %0, %1, %cst {dimension_numbers = #tpu.dot_dimension_numbers<[1], [0], [0], [1], [0, 0, 1, 1], [], []>} : vector<16x32xf32>, vector<32x256xf32>, vector<16x256xf32> -> vector<16x256xf32>
    %c0_3 = arith.constant 0 : index
    %c0_4 = arith.constant 0 : index
    %3 = vector.load %arg3[%c0_3, %c0_4] : memref<1x256xf32, #tpu.memory_space<vmem>>, vector<1x256xf32>
    %4 = vector.broadcast %3 : vector<1x256xf32> to vector<16x256xf32>
    %5 = arith.addf %2, %4 : vector<16x256xf32>
    %6 = vector.extract_strided_slice %5 {offsets = [0, 0], sizes = [16, 128], strides = [1, 1]} : vector<16x256xf32> to vector<16x128xf32>
    %cst_5 = arith.constant 0.000000e+00 : f32
    %7 = vector.broadcast %cst_5 : f32 to vector<16x128xf32>
    %8 = arith.cmpf ogt, %6, %7 : vector<16x128xf32>
    %cst_6 = arith.constant 1.000000e-01 : f32
    %9 = vector.broadcast %cst_6 : f32 to vector<16x128xf32>
    %10 = arith.mulf %9, %6 : vector<16x128xf32>
    %11 = arith.select %8, %6, %10 : vector<16x128xi1>, vector<16x128xf32>
    %12 = vector.extract_strided_slice %5 {offsets = [0, 128], sizes = [16, 128], strides = [1, 1]} : vector<16x256xf32> to vector<16x128xf32>
    %cst_7 = arith.constant 0.000000e+00 : f32
    %13 = vector.broadcast %cst_7 : f32 to vector<16x128xf32>
    %14 = arith.cmpf ogt, %12, %13 : vector<16x128xf32>
    %cst_8 = arith.constant 1.000000e-01 : f32
    %15 = vector.broadcast %cst_8 : f32 to vector<16x128xf32>
    %16 = arith.mulf %15, %12 : vector<16x128xf32>
    %17 = arith.select %14, %12, %16 : vector<16x128xi1>, vector<16x128xf32>
    %c0_9 = arith.constant 0 : index
    %c0_10 = arith.constant 0 : index
    %18 = vector.load %arg4[%c0_9, %c0_10] : memref<128x128xf32, #tpu.memory_space<vmem>>, vector<128x128xf32>
    %cst_11 = arith.constant dense<0.000000e+00> : vector<16x128xf32>
    %19 = tpu.matmul %11, %18, %cst_11 {dimension_numbers = #tpu.dot_dimension_numbers<[1], [0], [0], [1], [0, 0, 1, 1], [], []>} : vector<16x128xf32>, vector<128x128xf32>, vector<16x128xf32> -> vector<16x128xf32>
    %c0_12 = arith.constant 0 : index
    %c0_13 = arith.constant 0 : index
    %20 = vector.load %arg5[%c0_12, %c0_13] : memref<1x128xf32, #tpu.memory_space<vmem>>, vector<1x128xf32>
    %21 = vector.broadcast %20 : vector<1x128xf32> to vector<16x128xf32>
    %22 = arith.addf %19, %21 : vector<16x128xf32>
    %23 = arith.addf %22, %17 : vector<16x128xf32>
    %cst_14 = arith.constant 0.000000e+00 : f32
    %24 = vector.broadcast %cst_14 : f32 to vector<16x128xf32>
    %25 = arith.cmpf ogt, %23, %24 : vector<16x128xf32>
    %cst_15 = arith.constant 1.000000e-01 : f32
    %26 = vector.broadcast %cst_15 : f32 to vector<16x128xf32>
    %27 = arith.mulf %26, %23 : vector<16x128xf32>
    %28 = arith.select %25, %23, %27 : vector<16x128xi1>, vector<16x128xf32>
    %c0_16 = arith.constant 0 : index
    %c0_17 = arith.constant 0 : index
    %29 = vector.load %arg6[%c0_16, %c0_17] : memref<16x128xf32, #tpu.memory_space<vmem>>, vector<16x128xf32>
    tpu.vector_store %arg6[%c0_16, %c0_17], %28 {strides = array<i32>} : memref<16x128xf32, #tpu.memory_space<vmem>>, vector<16x128xf32>,
    return
  }
  func.func @transform_0(%arg0: i32) -> (i32, i32) {
    %c0_i32 = arith.constant 0 : i32
    %c0_i32_0 = arith.constant 0 : i32
    return %arg0, %c0_i32 : i32, i32
  }
  func.func @transform_1(%arg0: i32) -> (i32, i32) {
    %c0_i32 = arith.constant 0 : i32
    %c0_i32_0 = arith.constant 0 : i32
    %c0_i32_1 = arith.constant 0 : i32
    return %c0_i32, %c0_i32_0 : i32, i32
  }
  func.func @transform_2(%arg0: i32) -> (i32, i32) {
    %c0_i32 = arith.constant 0 : i32
    %c0_i32_0 = arith.constant 0 : i32
    %c0_i32_1 = arith.constant 0 : i32
    return %c0_i32, %c0_i32_0 : i32, i32
  }
  func.func @transform_3(%arg0: i32) -> (i32, i32) {
    %c0_i32 = arith.constant 0 : i32
    %c0_i32_0 = arith.constant 0 : i32
    %c0_i32_1 = arith.constant 0 : i32
    return %c0_i32, %c0_i32_0 : i32, i32
  }
  func.func @transform_4(%arg0: i32) -> (i32, i32) {
    %c0_i32 = arith.constant 0 : i32
    %c0_i32_0 = arith.constant 0 : i32
    %c0_i32_1 = arith.constant 0 : i32
    return %c0_i32, %c0_i32_0 : i32, i32
  }
  func.func @transform_5(%arg0: i32) -> (i32, i32) {
    %c0_i32 = arith.constant 0 : i32
    %c0_i32_0 = arith.constant 0 : i32
    return %arg0, %c0_i32 : i32, i32
  }
}

</mosaic_0001>

<bundles_post_ra>
// kernel: tpu_custom_call.1
= control target key start
LH: loop header
LB: loop body
LE: loop exit
PB: predicated region body
PF: predicated region fallthrough
CT: control target
= control target key end

     0   :  { %10 = vsyncpa [#allocation3], 0  ;;  %s465_s0 = inlined_call_operand.hbm [shape: f32[16,32], index: 0, kind: input, shape index: {}]   ;;  %s466_s1 = inlined_call_operand.hbm [shape: f32[32,256], index: 1, kind: input, shape index: {}]   ;;  %s467_s2 = inlined_call_operand.hbm [shape: f32[1,256], index: 2, kind: input, shape index: {}]   ;;  %s468_s3 = inlined_call_operand.hbm [shape: f32[128,128], index: 3, kind: input, shape index: {}]   ;;  %s469_s4 = inlined_call_operand.vmem [shape: f32[1,128], index: 4, kind: input, shape index: {}]   ;;  %s470_s5 = inlined_call_operand.hbm [shape: f32[16,128], index: 5, kind: output, shape index: {}]  }
   0x1   :  { %11 = vsyncpa [#allocation6], 0 }
   0x2   :  { %12 = vsyncpa [#allocation9], 0  ;;  %s31_s20 = sshll.u32 %s466_s1, 4  ;;  %s32_s20 = int_to_ptr.hbm [resolvable:$true] %s31_s20 }
   0x3   :  { %13 = vsyncpa [#allocation4], 0  ;;  %s395_s21 = smov [#allocation5]   ;;  %s18_s25 = sshll.u32 %s465_s0, 4  ;;  %s19_s25 = int_to_ptr.hbm [resolvable:$true] %s18_s25 }
   0x4   :  { %s33_s22 = sshll.u32 %s395_s21, 4  ;;  %s396_s26 = smov 256   ;;  %s34_s22 = int_to_ptr.vmem [resolvable:$true] %s33_s22 }
   0x5   :  { %s397_s27 = smov 16   ;;  %s398_s28 = smov [#allocation2]  }
   0x6   :  { %39 = dma.hbm_to_vmem [thread:$0]  %s32_s20, 1024, %s34_s22, [#allocation6], %s396_s26, %s396_s26, %s397_s27  }
   0x7   :  { %s20_s29 = sshll.u32 %s398_s28, 4  ;;  %s399_s30 = smov 128   ;;  %s21_s29 = int_to_ptr.vmem [resolvable:$true] %s20_s29 }
   0x8   :  { %s400_s6 = smov 8   ;;  %s45_s8 = sshll.u32 %s467_s2, 4  ;;  %s46_s8 = int_to_ptr.hbm [resolvable:$true] %s45_s8 }
   0x9   :  { %26 = dma.hbm_to_vmem [thread:$0]  %s19_s25, 256, %s21_s29, [#allocation3], %s399_s30, %s399_s30, %s400_s6  }
   0xa   :  { %s401_s9 = smov [#allocation7]   ;;  %s55_s12 = sshll.u32 %s468_s3, 4  ;;  %s56_s12 = int_to_ptr.hbm [resolvable:$true] %s55_s12 }
   0xb   :  { %s47_s0 = sshll.u32 %s401_s9, 4  ;;  %s402_s13 = smov [#allocation8]   ;;  %s48_s0 = int_to_ptr.vmem [resolvable:$true] %s47_s0 }
   0xc   :  { %50 = dma.hbm_to_vmem [thread:$0]  %s46_s8, 32, %s48_s0, [#allocation6]  }
   0xd   :  { %s57_s14 = sshll.u32 %s402_s13, 4  ;;  %s58_s14 = int_to_ptr.vmem [resolvable:$true] %s57_s14 }
   0xe   :  { %63 = dma.hbm_to_vmem [thread:$0]  %s56_s12, 2048, %s58_s14, [#allocation9], %s399_s30, %s399_s30, %s400_s6  }
   0xf   :  { %387 = dma.done.wait [#allocation3], 256  }
  0x10   :  { %388 = vsyncadd [#allocation3], 4294967040 }
  0x11   :  { %389 = dma.done.wait [#allocation6], 1056  }
  0x12   :  { %390 = vsyncadd [#allocation6], 4294966240 }
  0x13   :  { %391 = dma.done.wait [#allocation9], 2048  }
  0x14   :  { %392 = vsyncadd [#allocation9], 4294965248  ;;  %v90_v0 = vld [vmem:[#allocation5 + $0x30] sm:$0xff]  ;;  %v88_v1 = vld [vmem:[#allocation5 + $0x20] sm:$0xff]  ;;  %vm98_vm0 = vcmask 261120   ;;  %s403_s15 = smov [#allocation10]  }
  0x15   :  { %117 = vmatpush.msra.mxu0 %v90_v0  ;;  %v86_v2 = vld [vmem:[#allocation5 + $0x10] sm:$0xff]  ;;  %v178_v3 = vld [vmem:[#allocation8 + $0x78] sm:$0xff]  ;;  %v175_v8 = vld [vmem:[#allocation8 + $0x60] sm:$0xff]  ;;  %s222_s18 = sshll.u32 %s470_s5, 4  ;;  %s223_s18 = int_to_ptr.hbm [resolvable:$true] %s222_s18 }
  0x16   :  { %v177_v4 = vld [vmem:[#allocation8 + $0x70] sm:$0xff]  ;;  %183 = vmatpush.msra.mxu2 %v178_v3  ;;  %v84_v5 = vld [vmem:[#allocation5] sm:$0xff]  ;;  %v176_v6 = vld [vmem:[#allocation8 + $0x68] sm:$0xff]  ;;  %241 = vmatpush.msra.mxu3 %v178_v3 }
  0x17   :  { %118 = vmatpush.msra.mxu0 %v88_v1  ;;  %v82_v7 = vld [vmem:[#allocation2] sm:$0xff]  ;;  %v174_v9 = vld [vmem:[#allocation8 + $0x58] sm:$0xff]  ;;  %v171_v13 = vld [vmem:[#allocation8 + $0x40] sm:$0xff] }
  0x18   :  { %184 = vmatpush.msra.mxu2 %v177_v4  ;;  %242 = vmatpush.msra.mxu3 %v177_v4  ;;  %v173_v10 = vld [vmem:[#allocation8 + $0x50] sm:$0xff]  ;;  %v172_v11 = vld [vmem:[#allocation8 + $0x48] sm:$0xff]  ;;  %v170_v14 = vld [vmem:[#allocation8 + $0x38] sm:$0xff] }
  0x19   :  { %119 = vmatpush.msra.mxu0 %v86_v2  ;;  %v83_v12 = vld [vmem:[#allocation2 + $0x8] sm:$0xff]  ;;  %v168_v16 = vld [vmem:[#allocation8 + $0x28] sm:$0xff]  ;;  %v167_v17 = vld [vmem:[#allocation8 + $0x20] sm:$0xff] }
  0x1a   :  { %185 = vmatpush.msra.mxu2 %v176_v6  ;;  %243 = vmatpush.msra.mxu3 %v176_v6  ;;  %v169_v15 = vld [vmem:[#allocation8 + $0x30] sm:$0xff]  ;;  %v166_v18 = vld [vmem:[#allocation8 + $0x18] sm:$0xff]  ;;  %v89_v21 = vld [vmem:[#allocation5 + $0x28] sm:$0xff] }
  0x1b   :  { %120 = vmatpush.msra.mxu0 %v84_v5  ;;  %v91_v19 = vld [vmem:[#allocation5 + $0x38] sm:$0xff]  ;;  %v164_v22 = vld [vmem:[#allocation8 + $0x8] sm:$0xff]  ;;  %v163_v24 = vld [vmem:[#allocation8] sm:$0xff] }
  0x1c   :  { %237 = vmatmul.msk.f32.vlgmr.msra.gmra.mxu0 %vm98_vm0, %v82_v7  ;;  %186 = vmatpush.msra.mxu2 %v175_v8  ;;  %v165_v20 = vld [vmem:[#allocation8 + $0x10] sm:$0xff]  ;;  %v85_v25 = vld [vmem:[#allocation5 + $0x8] sm:$0xff]  ;;  %v92_v26 = vld [vmem:[#allocation7] sm:$0x3] }
  0x1d   :  { %244 = vmatpush.msra.mxu3 %v175_v8  ;;  %140 = vmatpush.msra.mxu1 %v91_v19  ;;  %v87_v23 = vld [vmem:[#allocation5 + $0x18] sm:$0xff]  ;;  %v94_v27 = vperm.slane %v92_v26, 0  ;;  %v95_v37 = vperm.slane %v92_v26, 1  ;;  %v266_v39 = vld [vmem:[%s469_s4] ss:$0 sm:$0xff]  ;;  %s220_s4 = sshll.u32 %s403_s15, 4  ;;  %s221_s4 = int_to_ptr.vmem [resolvable:$true] %s220_s4 }
  0x1e   :  { %187 = vmatpush.msra.mxu2 %v174_v9 }
  0x1f   :  { %245 = vmatpush.msra.mxu3 %v174_v9  ;;  %141 = vmatpush.msra.mxu1 %v89_v21 }
  0x20   :  { %188 = vmatpush.msra.mxu2 %v173_v10 }
  0x21   :  { %246 = vmatpush.msra.mxu3 %v173_v10  ;;  %142 = vmatpush.msra.mxu1 %v87_v23 }
  0x22   :  { %189 = vmatpush.msra.mxu2 %v172_v11 }
  0x23   :  { %247 = vmatpush.msra.mxu3 %v172_v11  ;;  %143 = vmatpush.msra.mxu1 %v85_v25 }
  0x24   :  { %238 = vmatmul.msk.f32.gmra.mxu0 %vm98_vm0, %v83_v12  ;;  %190 = vmatpush.msra.mxu2 %v171_v13 }
  0x25   :  { %248 = vmatpush.msra.mxu3 %v171_v13  ;;  %239 = vmatmul.msk.f32.vlgmr.msra.gmra.mxu1 %vm98_vm0, %v82_v7 }
  0x26   :  { %191 = vmatpush.msra.mxu2 %v170_v14 }
  0x27   :  { %249 = vmatpush.msra.mxu3 %v170_v14 }
  0x28   :  { %192 = vmatpush.msra.mxu2 %v169_v15 }
  0x29   :  { %250 = vmatpush.msra.mxu3 %v169_v15 }
  0x2a   :  { %193 = vmatpush.msra.mxu2 %v168_v16 }
  0x2b   :  { %251 = vmatpush.msra.mxu3 %v168_v16 }
  0x2c   :  { %194 = vmatpush.msra.mxu2 %v167_v17 }
  0x2d   :  { %252 = vmatpush.msra.mxu3 %v167_v17  ;;  %240 = vmatmul.msk.f32.gmra.mxu1 %vm98_vm0, %v83_v12 }
  0x2e   :  { %195 = vmatpush.msra.mxu2 %v166_v18 }
  0x2f   :  { %253 = vmatpush.msra.mxu3 %v166_v18 }
  0x30   :  { %196 = vmatpush.msra.mxu2 %v165_v20 }
  0x31   :  { %254 = vmatpush.msra.mxu3 %v165_v20 }
  0x32   :  { %197 = vmatpush.msra.mxu2 %v164_v22 }
  0x33   :  { %255 = vmatpush.msra.mxu3 %v164_v22 }
  0x34   :  { %198 = vmatpush.msra.mxu2 %v163_v24 }
  0x35   :  { %256 = vmatpush.msra.mxu3 %v163_v24 }
  0x99   :  { %v122_v28 = vpop.f32.mrf.mxu0 }
  0x9a   :  { %v123_v29 = vadd.f32 %v122_v28, %v94_v27 }
  0x9c   :  { %vm151_vm1 = vcmp.gt.f32.partialorder %v123_v29, 0.0  ;;  %v153_v30 = vmul.f32 0.1, %v123_v29 }
  0x9e   :  { %v155_v31 = vsel %vm151_vm1, %v123_v29, %v153_v30 }
  0x9f   :  { %199 = vmatmul.f32.vlgmr.msra.gmra.mxu2 %v155_v31 }
  0xa1   :  { %v125_v32 = vpop.f32.mrf.mxu0 }
  0xa2   :  { %v126_v33 = vadd.f32 %v125_v32, %v94_v27  ;;  %v145_v36 = vpop.f32.mrf.mxu1 }
  0xa3   :  { %v146_v38 = vadd.f32 %v145_v36, %v95_v37 }
  0xa4   :  { %vm152_vm2 = vcmp.gt.f32.partialorder %v126_v33, 0.0  ;;  %v154_v34 = vmul.f32 0.1, %v126_v33 }
  0xa5   :  { %v159_v40 = vmul.f32 0.1, %v146_v38  ;;  %vm157_vm3 = vcmp.gt.f32.partialorder %v146_v38, 0.0 }
  0xa6   :  { %v156_v35 = vsel %vm152_vm2, %v126_v33, %v154_v34 }
  0xa7   :  { %202 = vmatmul.f32.vlgmr.msra.gmra.mxu3 %v156_v35  ;;  %v161_v44 = vsel %vm157_vm3, %v146_v38, %v159_v40 }
  0xaa   :  { %v148_v41 = vpop.f32.mrf.mxu1 }
  0xab   :  { %v149_v45 = vadd.f32 %v148_v41, %v95_v37 }
  0xad   :  { %v160_v48 = vmul.f32 0.1, %v149_v45  ;;  %vm158_vm5 = vcmp.gt.f32.partialorder %v149_v45, 0.0 }
  0xaf   :  { %v162_v52 = vsel %vm158_vm5, %v149_v45, %v160_v48 }
 0x122   :  { %v200_v42 = vpop.f32.mrf.mxu2 }
 0x123   :  { %v201_v43 = vadd.f32 %v266_v39, %v200_v42 }
 0x125   :  { %v206_v46 = vadd.f32 %v201_v43, %v161_v44 }
 0x127   :  { %vm208_vm4 = vcmp.gt.f32.partialorder %v206_v46, 0.0  ;;  %v210_v47 = vmul.f32 0.1, %v206_v46 }
 0x129   :  { %v212_v49 = vsel %vm208_vm4, %v206_v46, %v210_v47 }
 0x12a   :  { %v203_v50 = vpop.f32.mrf.mxu3  ;;  %214 = vst [vmem:[#allocation10] sm:$0xff] %v212_v49 }
 0x12b   :  { %v204_v51 = vadd.f32 %v266_v39, %v203_v50 }
 0x12d   :  { %v207_v53 = vadd.f32 %v204_v51, %v162_v52 }
 0x12f   :  { %vm209_vm6 = vcmp.gt.f32.partialorder %v207_v53, 0.0  ;;  %v211_v54 = vmul.f32 0.1, %v207_v53 }
 0x131   :  { %v213_v55 = vsel %vm209_vm6, %v207_v53, %v211_v54 }
 0x132   :  { %215 = vst [vmem:[#allocation10 + $0x8] sm:$0xff] %v213_v55 }
 0x133   :  { %228 = dma.vmem_to_hbm [thread:$0]  %s221_s4, 256, %s223_s18, [#allocation4], %s399_s30, %s399_s30, %s400_s6  }
 0x134   :  { %393 = dma.done.wait [#allocation4], 256  }
 0x135   :  { %394 = vsyncadd [#allocation4], 4294967040 }
 0x136   :  { %233 = vsyncpa [#allocation3], 1 }
 0x137   :  { %234 = vsyncpa [#allocation6], 1 }
 0x138   :  { %235 = vsyncpa [#allocation9], 1 }
 0x139   :  { %236 = vsyncpa [#allocation4], 1 }

</bundles_post_ra>
